<compile_context>
chip_gen: v7x
topology: tpu7x:2x2x1
jax: 0.10.0
libtpu: 0.0.40
codegen_flags: <defaults>
</compile_context>

<pallas_src>
import functools

import numpy as np

import jax
import jax.numpy as jnp
from jax import lax
from jax.experimental import pallas as pl
from jax.experimental.pallas import tpu as pltpu


# ------------------------------- helpers ------------------------------------ #

def _round_up(x, m):
    return ((x + m - 1) // m) * m


def _pick_tile(mp, target):
    """Largest multiple-of-128 tile <= target that divides mp (mp if none)."""
    if mp % 128 != 0:
        return mp
    t = min(mp, max(128, (target // 128) * 128))
    while mp % t != 0:
        t -= 128
    return t


# ----------------------------- Pallas kernels ------------------------------- #

def _lateral_kernel(x_ref, w_ref, b_ref, o_ref):
    # x: (Cin, tm) bf16   w: (Cout, Cin) bf16   b: (Cout, 1) f32   o: (Cout, tm) f32
    acc = jnp.dot(w_ref[...], x_ref[...], preferred_element_type=jnp.float32)
    o_ref[...] = acc + b_ref[...]


def _lateral_up_kernel(x_ref, up_ref, src_ref, w_ref, b_ref, o_ref):
    # Fused lateral 1x1 conv + bias + in-kernel nearest-upsample add.
    # x:   (Cin, tm)   bf16
    # up:  (Cout, Mcp) f32   -- full (lane-padded) coarse map for this batch
    # src: (1, tm)     int32 -- fine flat index -> coarse flat index table
    # w:   (Cout, Cin) bf16,  b: (Cout, 1) f32,  o: (Cout, tm) f32
    acc = jnp.dot(w_ref[...], x_ref[...], preferred_element_type=jnp.float32)

    mcp = up_ref.shape[1]
    tm = o_ref.shape[1]
    # One-hot expansion matrix built from iota + the precomputed src table:
    # column k selects coarse column src[k].  The f32 matmul is an exact
    # selection (1.0 * value), so the top-down add keeps full f32 precision.
    j = lax.broadcasted_iota(jnp.int32, (mcp, tm), 0)
    sel = jnp.where(j == src_ref[...], jnp.float32(1.0), jnp.float32(0.0))
    up = jnp.dot(up_ref[...], sel, preferred_element_type=jnp.float32)

    o_ref[...] = acc + b_ref[...] + up


def _conv3x3_kernel(x_ref, w_ref, b_ref, o_ref, *, wrow, multi_tile):
    # In-kernel im2col 3x3 conv (padding=1) on a flattened, zero-padded map.
    # x: (Cin, (H+3)*wrow) bf16  -- spatial zero pad, row stride = wrow
    # w: (9, Cout, Cin) bf16     -- tap order dy*3+dx
    # b: (Cout, 1) f32           o: (Cout, tj) f32
    cout, tj = o_ref.shape
    if multi_tile:
        j0 = pl.program_id(1) * tj
        if tj % 128 == 0:
            j0 = pl.multiple_of(j0, 128)
    else:
        j0 = 0  # single tile per batch element: fully static slices
    acc = jnp.zeros((cout, tj), jnp.float32)
    for dy in range(3):
        for dx in range(3):
            tap = x_ref[:, pl.ds(j0 + dy * wrow + dx, tj)]
            acc = acc + jnp.dot(w_ref[dy * 3 + dx], tap,
                                preferred_element_type=jnp.float32)
    o_ref[...] = acc + b_ref[...]


# ------------------------------ Pallas wrappers ------------------------------ #

def _lateral(x_nchw, w, b, up=None, up_hw=None, *, tm_target=512):
    """Lateral 1x1 conv (+ fused nearest-upsample add of the coarse map).

    Returns the flattened, lane-padded map (N, Cout, Mp) in f32.
    """
    N, cin, H, W = x_nchw.shape
    cout = w.shape[0]
    M = H * W
    Mp = _round_up(M, 128)
    tm = _pick_tile(Mp, tm_target)
    grid = (N, Mp // tm)

    xf = x_nchw.reshape(N, cin, M)
    if Mp != M:
        xf = jnp.pad(xf, ((0, 0), (0, 0), (0, Mp - M)))
    xf = xf.astype(jnp.bfloat16)
    wb = w.astype(jnp.bfloat16)
    b2 = b.reshape(cout, 1).astype(jnp.float32)

    in_specs = [pl.BlockSpec((pl.Squeezed(), cin, tm), lambda n, m: (n, 0, m))]
    args = [xf]
    flops = 2 * N * Mp * cin * cout
    bytes_acc = xf.size * 2 + wb.size * 2 + b2.size * 4 + N * cout * Mp * 4

    if up is None:
        kernel = _lateral_kernel
    else:
        Hc, Wc = up_hw
        Mcp = up.shape[-1]
        # Trace-time src table (numpy, no in-kernel vector int division):
        # PyTorch 'nearest' with explicit size: src = floor(dst * in / out).
        fine = np.arange(Mp)
        fh, fw = fine // W, fine % W
        src = (fh * Hc) // H * Wc + (fw * Wc) // W
        src = np.where(fine < M, src, 2 ** 30).astype(np.int32)  # pads: no match
        src = jnp.asarray(src.reshape(1, Mp))
        in_specs += [
            pl.BlockSpec((pl.Squeezed(), cout, Mcp), lambda n, m: (n, 0, 0)),
            pl.BlockSpec((1, tm), lambda n, m: (0, m)),
        ]
        args += [up, src]
        kernel = _lateral_up_kernel
        flops += 2 * N * Mp * Mcp * cout
        bytes_acc += up.size * 4 + src.size * 4

    in_specs += [
        pl.BlockSpec((cout, cin), lambda n, m: (0, 0)),
        pl.BlockSpec((cout, 1), lambda n, m: (0, 0)),
    ]
    args += [wb, b2]

    return pl.pallas_call(
        kernel,
        out_shape=jax.ShapeDtypeStruct((N, cout, Mp), jnp.float32),
        grid=grid,
        in_specs=in_specs,
        out_specs=pl.BlockSpec((pl.Squeezed(), cout, tm), lambda n, m: (n, 0, m)),
        compiler_params=pltpu.CompilerParams(
            dimension_semantics=("parallel", "parallel"),
            vmem_limit_bytes=48 * 1024 * 1024),
        cost_estimate=pl.CostEstimate(
            flops=flops, transcendentals=0, bytes_accessed=bytes_acc),
    )(*args)


def _conv3x3(x_nchw, ow, ob, *, tj_target=512):
    """3x3 conv (padding=1) with in-kernel im2col; returns (N, Cout, H, W) f32."""
    N, cin, H, W = x_nchw.shape
    cout = ow.shape[0]

    # Row stride of the padded/flattened map; widened (when cheap) so the
    # flattened output length H*wrow is lane-dense (multiple of 128).
    wrow = W + 2
    if (H * wrow) % 128 != 0:
        for cand in range(W + 2, 2 * (W + 2) + 1):
            if (H * cand) % 128 == 0:
                wrow = cand
                break
    Mout = H * wrow
    tj = _pick_tile(Mout, tj_target)
    n_jt = Mout // tj

    # Zero pad: rows [1..H], cols [1..W] hold data; one extra bottom row gives
    # slack for the (harmless, trimmed) tail-column taps of the last row.
    xp = jnp.pad(x_nchw, ((0, 0), (0, 0), (1, 2), (1, wrow - W - 1)))
    xp = xp.reshape(N, cin, (H + 3) * wrow).astype(jnp.bfloat16)

    w9 = jnp.transpose(ow, (2, 3, 0, 1)).reshape(9, cout, cin).astype(jnp.bfloat16)
    b2 = ob.reshape(cout, 1).astype(jnp.float32)

    kernel = functools.partial(_conv3x3_kernel, wrow=wrow, multi_tile=n_jt > 1)
    flops = 2 * N * Mout * 9 * cin * cout
    bytes_acc = xp.size * 2 + w9.size * 2 + b2.size * 4 + N * cout * Mout * 4

    y = pl.pallas_call(
        kernel,
        out_shape=jax.ShapeDtypeStruct((N, cout, Mout), jnp.float32),
        grid=(N, n_jt),
        in_specs=[
            # Full padded map per batch element (DMA'd once per n).
            pl.BlockSpec((pl.Squeezed(), cin, (H + 3) * wrow),
                         lambda n, m: (n, 0, 0)),
            pl.BlockSpec((9, cout, cin), lambda n, m: (0, 0, 0)),
            pl.BlockSpec((cout, 1), lambda n, m: (0, 0)),
        ],
        out_specs=pl.BlockSpec((pl.Squeezed(), cout, tj), lambda n, m: (n, 0, m)),
        compiler_params=pltpu.CompilerParams(
            dimension_semantics=("parallel", "parallel"),
            vmem_limit_bytes=48 * 1024 * 1024),
        cost_estimate=pl.CostEstimate(
            flops=flops, transcendentals=0, bytes_accessed=bytes_acc),
    )(xp, w9, b2)
    return y.reshape(N, cout, H, wrow)[:, :, :, :W]


# ------------------------------- Glue (JAX) ---------------------------------- #

def fpn_forward(inputs_nchw, params):
    """Matches FPN.forward.

    inputs_nchw: list of (N, Cin_i, H_i, W_i)
    params[i]: {"lw": (Cout, Cin_i), "lb": (Cout,),
                "ow": (Cout, Cout, 3, 3), "ob": (Cout,)}  (PyTorch layouts)
    Returns list of (N, Cout, H_i, W_i).
    """
    L = len(inputs_nchw)
    shapes = [x.shape for x in inputs_nchw]
    N = shapes[0][0]

    # Lateral 1x1 convs with the top-down upsample-add fused in (coarse->fine).
    lat = [None] * L                      # (N, Cout, Mp) f32, flattened/padded
    lat[-1] = _lateral(inputs_nchw[-1], params[-1]["lw"], params[-1]["lb"])
    for i in range(L - 2, -1, -1):
        lat[i] = _lateral(inputs_nchw[i], params[i]["lw"], params[i]["lb"],
                          up=lat[i + 1], up_hw=shapes[i + 1][2:])

    # 3x3 output convs with in-kernel im2col.
    outs = []
    for i in range(L):
        _, _, H, W = shapes[i]
        cout = params[i]["lw"].shape[0]
        lat_nchw = lat[i][:, :, :H * W].reshape(N, cout, H, W)
        outs.append(_conv3x3(lat_nchw, params[i]["ow"], params[i]["ob"]))
    return outs


# ------------------------------ Reference (JAX) ------------------------------ #

def _nearest_upsample_nchw(x, out_h, out_w):
    """PyTorch F.interpolate(mode='nearest'): src = floor(dst * in / out)."""
    N, C, H, W = x.shape
    ih = (jnp.arange(out_h) * H) // out_h
    iw = (jnp.arange(out_w) * W) // out_w
    return x[:, :, ih][:, :, :, iw]


def _ref_forward(inputs_nchw, params):
    """Pure-JAX reference mirroring the kernel's bf16 operand / f32 accum math."""
    def conv(x, w, pad):
        dn = lax.conv_dimension_numbers(x.shape, w.shape, ("NCHW", "OIHW", "NCHW"))
        return lax.conv_general_dilated(
            x.astype(jnp.bfloat16), w.astype(jnp.bfloat16), (1, 1), pad,
            dimension_numbers=dn, preferred_element_type=jnp.float32)

    lat = []
    for x, p in zip(inputs_nchw, params):
        y = conv(x, p["lw"][:, :, None, None], "VALID")
        lat.append(y + p["lb"].reshape(1, -1, 1, 1))
    for i in range(len(lat) - 1, 0, -1):
        H, W = lat[i - 1].shape[2], lat[i - 1].shape[3]
        lat[i - 1] = lat[i - 1] + _nearest_upsample_nchw(lat[i], H, W)
    outs = []
    for x, p in zip(lat, params):
        y = conv(x, p["ow"], ((1, 1), (1, 1)))
        outs.append(y + p["ob"].reshape(1, -1, 1, 1))
    return outs


# ---------------------------------- Main ------------------------------------- #

if __name__ == "__main__":
    in_channels_list = [4, 8, 16]
    out_channels = 8
    N = 2
    spatial = [(16, 16), (8, 8), (4, 4)]

    key = jax.random.PRNGKey(0)
    keys = jax.random.split(key, 1 + 4 * len(in_channels_list))

    # Deterministic parameter init (synthetic; PyTorch Conv2d weight layouts).
    params = []
    k_idx = 1
    for cin in in_channels_list:
        lw = 0.1 * jax.random.normal(keys[k_idx], (out_channels, cin), jnp.float32)
        lb = 0.1 * jax.random.normal(keys[k_idx + 1], (out_channels,), jnp.float32)
        ow = 0.1 * jax.random.normal(keys[k_idx + 2],
                                     (out_channels, out_channels, 3, 3),
                                     jnp.float32)
        ob = 0.1 * jax.random.normal(keys[k_idx + 3], (out_channels,), jnp.float32)
        params.append({"lw": lw, "lb": lb, "ow": ow, "ob": ob})
        k_idx += 4

    # Deterministic inputs (NCHW, matching PyTorch).
    in_keys = jax.random.split(keys[0], len(in_channels_list))
    inputs = [jax.random.normal(k, (N, cin, h, w), jnp.float32)
              for k, cin, (h, w) in zip(in_keys, in_channels_list, spatial)]

    outs = fpn_forward(inputs, params)
    outs = [jax.block_until_ready(o) for o in outs]

    # Sanity check against the bf16-operand / f32-accumulate JAX reference.
    refs = _ref_forward(inputs, params)
    for o, r in zip(outs, refs):
        assert o.shape == r.shape, (o.shape, r.shape)
        err = float(jnp.abs(o - r).max())
        assert jnp.allclose(o, r, atol=2e-2, rtol=2e-2), err

    print("KERNEL_OK")
</pallas_src>

<mosaic_0001>
module attributes {stable_mosaic.version = 11 : i64} {
  func.func @_lateral_kernel(%arg0: i32, %arg1: i32, %arg2: memref<1x16x128xbf16, #tpu.memory_space<vmem>>, %arg3: memref<8x16xbf16, #tpu.memory_space<vmem>>, %arg4: memref<8x1xf32, #tpu.memory_space<vmem>>, %arg5: memref<1x8x128xf32, #tpu.memory_space<vmem>>) attributes {dimension_semantics = [#tpu.dimension_semantics<parallel>, #tpu.dimension_semantics<parallel>], iteration_bounds = array<i64: 2, 1>, scalar_prefetch = 0 : i64, scratch_operands = 0 : i64, tpu.core_type = #tpu.core_type<tc>, window_params = [{transform_indices = @transform_0, window_bounds = array<i64: 1, 16, 128>}, {pipeline_mode = #tpu.pipeline_mode<synchronous>, transform_indices = @transform_1, window_bounds = array<i64: 8, 16>}, {pipeline_mode = #tpu.pipeline_mode<synchronous>, transform_indices = @transform_2, window_bounds = array<i64: 8, 1>}, {transform_indices = @transform_3, window_bounds = array<i64: 1, 8, 128>}]} {
    %c0 = arith.constant 0 : index
    %c0_0 = arith.constant 0 : index
    %0 = vector.load %arg3[%c0, %c0_0] : memref<8x16xbf16, #tpu.memory_space<vmem>>, vector<8x16xbf16>
    %c0_1 = arith.constant 0 : index
    %c0_2 = arith.constant 0 : index
    %c0_3 = arith.constant 0 : index
    %1 = vector.load %arg2[%c0_1, %c0_2, %c0_3] : memref<1x16x128xbf16, #tpu.memory_space<vmem>>, vector<1x16x128xbf16>
    %2 = vector.shape_cast %1 : vector<1x16x128xbf16> to vector<16x128xbf16>
    %cst = arith.constant dense<0.000000e+00> : vector<8x128xf32>
    %3 = tpu.matmul %0, %2, %cst {dimension_numbers = #tpu.dot_dimension_numbers<[1], [0], [0], [1], [0, 0, 1, 1], [], []>} : vector<8x16xbf16>, vector<16x128xbf16>, vector<8x128xf32> -> vector<8x128xf32>
    %c0_4 = arith.constant 0 : index
    %c0_5 = arith.constant 0 : index
    %4 = vector.load %arg4[%c0_4, %c0_5] : memref<8x1xf32, #tpu.memory_space<vmem>>, vector<8x1xf32>
    %5 = vector.broadcast %4 : vector<8x1xf32> to vector<8x128xf32>
    %6 = arith.addf %3, %5 : vector<8x128xf32>
    %c0_6 = arith.constant 0 : index
    %c0_7 = arith.constant 0 : index
    %c0_8 = arith.constant 0 : index
    %7 = vector.load %arg5[%c0_6, %c0_7, %c0_8] : memref<1x8x128xf32, #tpu.memory_space<vmem>>, vector<1x8x128xf32>
    %8 = vector.shape_cast %7 : vector<1x8x128xf32> to vector<8x128xf32>
    %9 = vector.shape_cast %6 : vector<8x128xf32> to vector<1x8x128xf32>
    tpu.vector_store %arg5[%c0_6, %c0_7, %c0_8], %9 {strides = array<i32>} : memref<1x8x128xf32, #tpu.memory_space<vmem>>, vector<1x8x128xf32>,
    return
  }
  func.func @transform_0(%arg0: i32, %arg1: i32) -> (i32, i32, i32) {
    %c0_i32 = arith.constant 0 : i32
    %c0_i32_0 = arith.constant 0 : i32
    return %arg0, %c0_i32, %arg1 : i32, i32, i32
  }
  func.func @transform_1(%arg0: i32, %arg1: i32) -> (i32, i32) {
    %c0_i32 = arith.constant 0 : i32
    %c0_i32_0 = arith.constant 0 : i32
    %c0_i32_1 = arith.constant 0 : i32
    return %c0_i32, %c0_i32_0 : i32, i32
  }
  func.func @transform_2(%arg0: i32, %arg1: i32) -> (i32, i32) {
    %c0_i32 = arith.constant 0 : i32
    %c0_i32_0 = arith.constant 0 : i32
    %c0_i32_1 = arith.constant 0 : i32
    return %c0_i32, %c0_i32_0 : i32, i32
  }
  func.func @transform_3(%arg0: i32, %arg1: i32) -> (i32, i32, i32) {
    %c0_i32 = arith.constant 0 : i32
    %c0_i32_0 = arith.constant 0 : i32
    return %arg0, %c0_i32, %arg1 : i32, i32, i32
  }
}

</mosaic_0001>

<bundles_post_ra>
// kernel: tpu_custom_call.1
= control target key start
LH: loop header
LB: loop body
LE: loop exit
PB: predicated region body
PF: predicated region fallthrough
CT: control target
= control target key end

     0   :  { %8 = vsyncpa [#allocation3], 0  ;;  %s777_s0 = inlined_call_operand.hbm [shape: bf16[2,16,128], index: 0, kind: input, shape index: {}]   ;;  %s778_s1 = inlined_call_operand.vmem [shape: bf16[8,16], index: 1, kind: input, shape index: {}]   ;;  %s779_s2 = inlined_call_operand.vmem [shape: f32[8,1], index: 2, kind: input, shape index: {}]   ;;  %s780_s3 = inlined_call_operand.hbm [shape: f32[2,8,128], index: 3, kind: output, shape index: {}]  }
   0x1   :  { %10 = vsyncpa [#allocation3 + $0x1], 0 }
   0x2   :  { %11 = vsyncpa [#allocation4], 0 }
   0x3   :  { %13 = vsyncpa [#allocation4 + $0x1], 0  ;;  %s598_s12 = smov 0   ;;  %s600_s13 = smov 0  }
   0x4   :  { %s602_s14 = smov 0   ;;  %s604_s15 = smov 0  }
   0x5   :  { %s606_s16 = smov 0   ;;  %s608_s17 = smov 0  }
   0x6 LB: > { %s363_s18 = sadd.s32 4294967295, %s569_s17   ;;  %s364_s19 = sadd.s32 4294967294, %s569_s17   ;;  %s569_s17 = sphi %s608_s17, %s19_s17   ;;  %s565_s16 = sphi %s606_s16, %s795_s16   ;;  %s561_s15 = sphi %s604_s15, %s794_s15   ;;  %s557_s14 = sphi %s602_s14, %s793_s14   ;;  %s553_s13 = sphi %s600_s13, %s792_s13   ;;  %s549_s12 = sphi %s598_s12, %s791_s12  }
   0x7   : > { %s31_s20 = sadd.s32 1, %s565_s16  ;;  %s40_s21 = sadd.s32 1, %s557_s14 }
   0x8   : > { %p33_p0 = scmp.ge.s32.totalorder %s31_s20, 2  ;;  %p47_p1 = scmp.ne.s32.totalorder %s557_s14, %s553_s13 }
   0x9   : > { %p48_p2 = scmp.eq.s32.totalorder %s569_s17, 0  ;;  %p53_p3 = scmp.ne.s32.totalorder %s553_s13, %s549_s12 }
   0xa   : > { %s797_s20 = smov (%p33_p0, %s31_s20), 0  ;;  %p54_p5 = scmp.eq.s32.totalorder %s363_s18, 0 }
   0xb   : > { %p639_p4 = por %p48_p2, %p47_p1  ;;  %s35_s23 = ssub.s32 %s565_s16, %s797_s20 }
   0xc   : > { %p121_p6 = scmp.eq.s32.totalorder %s363_s18, 1  ;;  %p38_p7 = scmp.eq.s32.totalorder %s35_s23, 0 }
   0xd   : > { %p645_p8 = por %p54_p5, %p53_p3  ;;  %p127_p10 = scmp.eq.s32.totalorder %s364_s19, 1 }
   0xe   : > { %p649_p9 = por %p121_p6, %p47_p1  ;;  %p400_p13 = scmp.lt.s32.totalorder %s569_s17, 2 }
   0xf   : > { %s654_s26 = scalar_select %p38_p7, %s557_s14, %s40_s21  }
  0x10   : > { %s784_s25 = scalar_select %p649_p9, 1, 0 }
  0x11   : > { %p656_p11 = por %p127_p10, %p53_p3  ;;  %s153_s28 = sand.u32 1, %s557_s14  }
  0x12   : > { %s367_s29 = sshll.u32 %s153_s28, 3  ;;  %s379_s30 = sshll.u32 %s565_s16, 7 }
  0x13   : > { %s785_s27 = scalar_select %p656_p11, 1, 0 }
  0x14   : > { %s667_s6 = scalar_lea.hbm %s777_s0, %s379_s30  ;;  %s157_s7 = scalar_lea.vmem [#allocation2], %s367_s29 }
  0x15   : > { %s165_s8 = sshll.u32 %s157_s7, 4  ;;  %p673_p0 = pnand %p400_p13, %p639_p4  ;;  %s669_s8 = int_to_ptr.vmem [resolvable:$true] %s165_s8 }
  0x16   : > { %s678_s10 = scalar_lea.sflag [#allocation3], %s153_s28  ;;  %s457_s11 = scalar_lea.hbm %s667_s6, 128 }
  0x17   : > { %p458_p2 = scmp.ne.s32.totalorder %s667_s6, %s457_s11  ;;  %p459_p3 = pneg %p673_p0 }
  0x18   : > { %s462_s21 = scalar_lea.hbm %s777_s0, 256  ;;  %p463_p4 = scmp.lt.u32.totalorder %s667_s6, %s777_s0 }
  0x19   : > { %p460_p5 = pnand %p459_p3, %p458_p2  ;;  %p464_p7 = scmp.lt.u32.totalorder %s462_s21, %s457_s11 }
  0x1a   : > { %p466_p13 = scmp.lt.u32.totalorder %s457_s11, %s667_s6 }
  0x1b   : > { %p461_p6 = pneg %p460_p5  ;;  %p465_p10 = por %p464_p7, %p463_p4 }
  0x1d   : > { %p467_p12 = por %p466_p13, %p465_p10 }
  0x1f   : > { %p468_p1 = pnand %p467_p12, %p461_p6 }
  0x21   : > { %471 = shalt.err (!%p468_p1)
}
  0x22   : > { %s472_s28 = scalar_lea.vmem %s669_s8, 128  ;;  %s571_s29 = smov [#allocation2]  }
  0x23   : > { %p473_p2 = scmp.ne.s32.totalorder %s669_s8, %s472_s28  ;;  %s477_s30 = sshll.u32 %s571_s29, 4  ;;  %s478_s30 = int_to_ptr.vmem [resolvable:$false] %s477_s30 }
  0x24   : > { %s479_s4 = scalar_lea.vmem %s478_s30, 256  ;;  %p480_p9 = scmp.lt.s32.totalorder %s669_s8, %s478_s30 }
  0x25   : > { %p475_p5 = pnand %p473_p2, %p459_p3  ;;  %p481_p4 = scmp.lt.s32.totalorder %s479_s4, %s472_s28 }
  0x27   : > { %p476_p11 = pneg %p475_p5  ;;  %p482_p7 = por %p481_p4, %p480_p9 }
  0x29   : > { %p483_p10 = pnand %p482_p7, %p476_p11 }
  0x2b   : > { %486 = shalt.err (!%p483_p10)
}
  0x2c   : > { %s572_s5 = smov 64   ;;  %s573_s7 = smov 4  }
  0x2d   : > { %395 = dma.hbm_to_vmem [thread:$0]  (!%p673_p0), %s667_s6, 128, %s669_s8, %s678_s10, %s572_s5, %s572_s5, %s573_s7  }
  0x2e   : > { %p173_p12 = scmp.lt.s32.totalorder %s569_s17, 3  ;;  %p787_p1 = scmp.ge.s32.totalorder %s569_s17, 1 }
  0x30   : > { %p174_p3 = pnand %p787_p1, %p173_p12 }
  0x31   : > { %s710_s11 = sand.u32 (!%p174_p3), 1, %s553_s13  }
  0x32   : > { %177 = sbr.rel (%p174_p3) target bundleno = 291 (0x123), region = 32  ;;  %s371_s18 = sshll.u32 (!%p174_p3), %s710_s11, 3 }
  0x33   : > { %s180_s19 = scalar_lea.sflag (!%p174_p3), [#allocation3], %s710_s11  ;;  %s183_s21 = scalar_lea.vmem (!%p174_p3), [#allocation2], %s371_s18 }
  0x39   : > { %540 = dma.done.wait (%p645_p8), %s180_s19, 128  }
  0x3a   : > { %542 = vsyncadd (%p645_p8), %s180_s19, 4294967168  ;;  %v574_v0 = vmov 0.0   ;;  %vm575_vm0 = vmmov 0   ;;  %v576_v1 = vmov 0   ;;  %v456_v2 = vld [vmem:[%s183_s21] sm:$0xff]   ;;  %vm222_vm1 = vcmask 130048  }
  0x3b   : > { %382 = vmatprep.subr.bf16.mxu0 %v574_v0  ;;  %384 = vmatprep.mubr.msk.bf16.mxu0 %vm575_vm0, %v574_v0  ;;  %v210_v3 = vld [vmem:[%s779_s2] sm:$0xff]  ;;  %s376_s24 = sshll.u32 %s561_s15, 7  ;;  %s205_s22 = scalar_lea.vmem [#allocation5], %s371_s18 }
  0x3c   : > { %455 = vset.pattern.permute.xlu0 %v576_v1  ;;  %383 = vmatpush3.bf16.msra.mxu0 %v456_v2  ;;  %v207_v4 = vld [vmem:[%s778_s1] sm:$0xf]  ;;  %s282_s23 = sshll.u32 %s205_s22, 4  ;;  %s728_s30 = scalar_lea.hbm %s780_s3, %s376_s24  ;;  %s730_s23 = int_to_ptr.vmem [resolvable:$true] %s282_s23 }
  0x3d   : > { %213 = vperm.xlu0 %455, %v210_v3   ;;  %s268_s4 = scalar_lea.sflag [#allocation4], %s710_s11  ;;  %s487_s15 = scalar_lea.vmem %s730_s23, 128 }
  0x3e   : > { %p488_p8 = scmp.ne.s32.totalorder %s730_s23, %s487_s15  ;;  %p788_p9 = scmp.ne.s32.totalorder %s784_s25, 0 }
  0x3f   : > { %385 = vmatmul.mubr.msk.bf16.vlgmr.msra.gmra.mrb[0].mxu0 %vm222_vm1, %v207_v4  ;;  %s577_s5 = smov [#allocation5]  }
  0x40   : > { %p489_p11 = pnand %p488_p8, %p788_p9  ;;  %s491_s7 = sshll.u32 %s577_s5, 4  ;;  %s492_s7 = int_to_ptr.vmem [resolvable:$false] %s491_s7 }
  0x41   : > { %s493_s18 = scalar_lea.vmem %s492_s7, 256  ;;  %p494_p6 = scmp.lt.s32.totalorder %s730_s23, %s492_s7 }
  0x42   : > { %p490_p0 = pneg %p489_p11  ;;  %p495_p13 = scmp.lt.s32.totalorder %s493_s18, %s487_s15 }
  0x44   : > { %p496_p2 = por %p495_p13, %p494_p6 }
  0x46   : > { %p497_p5 = pnand %p496_p2, %p490_p0 }
  0xbc   : > { %v214_v5 = vpop.permute.xlu0 %213 }
 0x112   : > { %v260_v6 = vpop.f32.mrb[0].mxu0 }
 0x113   : > { %v261_v7 = vadd.f32 %v260_v6, %v214_v5  ;;  %v386_v8 = vpop.f32.mrb[1].mxu0 }
 0x114   : > { %v263_v9 = vpop.f32.mrb[2].mxu0 }
 0x115   : > { %266 = vst [vmem:[%s205_s22] sm:$0xff] %v261_v7  ;;  %v387_v10 = vpop.f32.mrb[3].mxu0 }
 0x116   : > { %500 = shalt.err (!%p497_p5)
}
 0x117   : > { %s501_s11 = scalar_lea.hbm %s728_s30, 128  ;;  %s505_s6 = scalar_lea.hbm %s780_s3, 256 }
 0x118   : > { %p502_p4 = scmp.ne.s32.totalorder %s728_s30, %s501_s11  ;;  %p506_p12 = scmp.lt.u32.totalorder %s728_s30, %s780_s3 }
 0x119   : > { %p507_p1 = scmp.lt.u32.totalorder %s505_s6, %s501_s11  ;;  %p509_p8 = scmp.lt.u32.totalorder %s501_s11, %s728_s30 }
 0x11a   : > { %p503_p7 = pnand %p502_p4, %p788_p9 }
 0x11b   : > { %p508_p3 = por %p507_p1, %p506_p12 }
 0x11c   : > { %p504_p10 = pneg %p503_p7 }
 0x11d   : > { %p510_p11 = por %p509_p8, %p508_p3 }
 0x11f   : > { %p511_p0 = pnand %p510_p11, %p504_p10 }
 0x121   : > { %514 = shalt.err (!%p511_p0)
}
 0x122   : > { %390 = dma.vmem_to_hbm [thread:$0]  (%p788_p9), %s730_s23, 128, %s728_s30, %s268_s4  }
 0x123 PF: > { %s294_s10 = sand.u32 1, %s549_s12   ;;  %p789_p6 = scmp.ne.s32.totalorder %s785_s27, 0 }
 0x124   : > { %p790_p13 = scmp.ge.s32.totalorder %s569_s17, 2  ;;  %s295_s24 = scalar_lea.sflag [#allocation4], %s294_s10 }
 0x126   : > { %p397_p2 = pnand %p790_p13, %p789_p6 }
 0x128   : > { %544 = dma.done.wait (!%p397_p2), %s295_s24, 128  }
 0x129   : > { %546 = vsyncadd (!%p397_p2), %s295_s24, 4294967168  ;;  %s19_s17 = sadd.s32 1, %s569_s17   ;;  %s791_s12 = smov %s553_s13 }
 0x12a   : > { %p16_p5 = scmp.ge.s32.totalorder %s19_s17, 4   ;;  %s792_s13 = smov %s557_s14 }
 0x12b   : > { %s793_s14 = smov %s654_s26  ;;  %s794_s15 = smov %s565_s16 }
 0x12c   : > { %s795_s16 = smov %s797_s20  ;;  %18 = sbr.rel (!%p16_p5) target bundleno = 6 (0x6), region = 77 }
 0x133   :  { %300 = vsyncpa [#allocation3], 1 }
 0x134   :  { %302 = vsyncpa [#allocation3 + $0x1], 1 }
 0x135   :  { %303 = vsyncpa [#allocation4], 1 }
 0x136   :  { %305 = vsyncpa [#allocation4 + $0x1], 1 }

</bundles_post_ra>
